<compile_context>
chip_gen: v5e
topology: v5e:2x2
jax: 0.10.0
libtpu: 0.0.40
codegen_flags: <defaults>
</compile_context>

<pallas_src>
import functools

import jax
import jax.numpy as jnp
from jax.experimental import pallas as pl
from jax.experimental.pallas import tpu as pltpu

_LANE = 128
_SUBLANE = 8
_MAX_TILE_R = 2048
_VMEM_BUDGET = 12 * 1024 * 1024  # fits the 16 MiB v5e scoped default


def _round_up(x, m):
    return ((x + m - 1) // m) * m


def _pick_tile_r(r_padded, din, dout_p):
    """Largest row tile (multiple of 8, <= 2048) whose double-buffered x/out
    tiles plus the resident weight/bias fit the VMEM budget."""
    per_row = din * 2 + dout_p * 4          # bf16 x row + f32 out row
    resident = din * dout_p * 2 + dout_p * 4  # bf16 W + f32 b
    budget = max(_VMEM_BUDGET - 2 * resident, 2 * _SUBLANE * per_row)
    tile = (budget // (2 * per_row)) // _SUBLANE * _SUBLANE
    tile = max(_SUBLANE, min(tile, _MAX_TILE_R, r_padded))
    return tile


def _linear_kernel(x_ref, w_ref, b_ref, o_ref):
    # MXU matmul on bf16 operands with f32 accumulation; bias add rides the
    # free VPU slot under the MXU.
    acc = jnp.dot(x_ref[...], w_ref[...], preferred_element_type=jnp.float32)
    o_ref[...] = (acc + b_ref[...]).astype(o_ref.dtype)


def pallas_linear(x, w_p, b_p):
    """y = x @ w_p + b_p, row-tiled.  w_p:[Din, Dout_p], b_p:[1, Dout_p] with
    Dout_p a multiple of 128 (lane-dense output)."""
    R, Din = x.shape
    Dout_p = w_p.shape[1]

    # Memory-bound: halve HBM bytes of the streamed operand and of the weight.
    x_bf = x.astype(jnp.bfloat16)
    w_bf = w_p.astype(jnp.bfloat16)
    b_f32 = b_p.astype(jnp.float32)

    tile_r = _pick_tile_r(_round_up(R, _SUBLANE), Din, Dout_p)
    R_pad = _round_up(R, tile_r)
    if R_pad != R:
        x_bf = jnp.pad(x_bf, ((0, R_pad - R), (0, 0)))

    grid = (R_pad // tile_r,)
    cost = pl.CostEstimate(
        flops=2 * R_pad * Din * Dout_p,
        transcendentals=0,
        bytes_accessed=(R_pad * Din * 2          # x (bf16)
                        + Din * Dout_p * 2       # W (bf16)
                        + Dout_p * 4             # b (f32)
                        + R_pad * Dout_p * 4),   # y (f32)
    )

    y = pl.pallas_call(
        _linear_kernel,
        out_shape=jax.ShapeDtypeStruct((R_pad, Dout_p), jnp.float32),
        grid=grid,
        in_specs=[
            pl.BlockSpec((tile_r, Din), lambda i: (i, 0)),   # streamed row tiles
            pl.BlockSpec((Din, Dout_p), lambda i: (0, 0)),   # VMEM-resident weight
            pl.BlockSpec((1, Dout_p), lambda i: (0, 0)),     # VMEM-resident bias
        ],
        out_specs=pl.BlockSpec((tile_r, Dout_p), lambda i: (i, 0)),
        compiler_params=pltpu.CompilerParams(
            dimension_semantics=("parallel",),
        ),
        cost_estimate=cost,
    )(x_bf, w_bf, b_f32)
    return y[:R]


@functools.partial(jax.jit, static_argnums=(6,))
def _encode(x, edge_attr, node_w_p, node_b_p, edge_w_p, edge_b_p, hidden):
    # Both pallas_calls dispatched from one XLA program (amortize launch cost,
    # let the edge encode's DMA hide under the node encode's tail).
    x_out = pallas_linear(x, node_w_p, node_b_p)[:, :hidden]
    e_out = pallas_linear(edge_attr, edge_w_p, edge_b_p)[:, :hidden]
    return x_out, e_out


class FeatureEncoderPallas:
    """Pallas re-implementation of FeatureEncoder:
    Sequential(LinearNodeEncoder(hidden), LinearEdgeEncoder(hidden)); each
    encoder consumes the graph `batch` (dict here) and writes back the encoded
    node / edge features."""

    def __init__(self, node_in_dim, edge_in_dim, hidden, key):
        k1, k2, k3, k4 = jax.random.split(key, 4)
        self.hidden = hidden
        hp = _round_up(hidden, _LANE)
        pad = hp - hidden

        # Deterministic synthetic parameters (nn.Linear-shaped, stored as
        # [in, out] so y = x @ W + b).
        self.node_w = jax.random.normal(k1, (node_in_dim, hidden), jnp.float32) * 0.1
        self.node_b = jax.random.normal(k2, (1, hidden), jnp.float32) * 0.1
        self.edge_w = jax.random.normal(k3, (edge_in_dim, hidden), jnp.float32) * 0.1
        self.edge_b = jax.random.normal(k4, (1, hidden), jnp.float32) * 0.1

        # Lane-dense padded copies used by the kernels (zero columns, sliced
        # off after the kernel so semantics are unchanged).
        self.node_w_p = jnp.pad(self.node_w, ((0, 0), (0, pad)))
        self.node_b_p = jnp.pad(self.node_b, ((0, 0), (0, pad)))
        self.edge_w_p = jnp.pad(self.edge_w, ((0, 0), (0, pad)))
        self.edge_b_p = jnp.pad(self.edge_b, ((0, 0), (0, pad)))

    def __call__(self, batch):
        # nn.Sequential: node encoder then edge encoder; each mutates its slot
        # of the batch and passes the batch along.
        batch = dict(batch)
        x_out, e_out = _encode(batch["x"], batch["edge_attr"],
                               self.node_w_p, self.node_b_p,
                               self.edge_w_p, self.edge_b_p,
                               self.hidden)
        batch["x"] = x_out
        batch["edge_attr"] = e_out
        return batch


if __name__ == "__main__":
    key = jax.random.PRNGKey(0)
    k_x, k_e, k_p = jax.random.split(key, 3)

    n_nodes, node_in = 16, 8
    n_edges, edge_in = 32, 4
    hidden = 32

    batch = {
        "x": jax.random.normal(k_x, (n_nodes, node_in), jnp.float32),
        "edge_attr": jax.random.normal(k_e, (n_edges, edge_in), jnp.float32),
    }

    enc = FeatureEncoderPallas(node_in, edge_in, hidden, k_p)
    out = enc(batch)
    jax.block_until_ready(out["x"])
    jax.block_until_ready(out["edge_attr"])

    assert out["x"].shape == (n_nodes, hidden)
    assert out["edge_attr"].shape == (n_edges, hidden)

    # Reference check against plain JAX f32 (same math as nn.Linear forward).
    # Tolerance relaxed because the kernel uses bf16 matmul operands with f32
    # accumulation.
    ref_x = batch["x"] @ enc.node_w + enc.node_b
    ref_e = batch["edge_attr"] @ enc.edge_w + enc.edge_b
    assert jnp.allclose(out["x"], ref_x, atol=2e-2, rtol=2e-2)
    assert jnp.allclose(out["edge_attr"], ref_e, atol=2e-2, rtol=2e-2)

    print("KERNEL_OK")
</pallas_src>

<mosaic_0001>
module attributes {stable_mosaic.version = 11 : i64} {
  func.func @_linear_kernel(%arg0: i32, %arg1: memref<32x4xbf16, #tpu.memory_space<vmem>>, %arg2: memref<4x128xbf16, #tpu.memory_space<vmem>>, %arg3: memref<1x128xf32, #tpu.memory_space<vmem>>, %arg4: memref<32x128xf32, #tpu.memory_space<vmem>>) attributes {dimension_semantics = [#tpu.dimension_semantics<parallel>], iteration_bounds = array<i64: 1>, scalar_prefetch = 0 : i64, scratch_operands = 0 : i64, tpu.core_type = #tpu.core_type<tc>, window_params = [{transform_indices = @transform_0, window_bounds = array<i64: 32, 4>}, {pipeline_mode = #tpu.pipeline_mode<synchronous>, transform_indices = @transform_1, window_bounds = array<i64: 4, 128>}, {pipeline_mode = #tpu.pipeline_mode<synchronous>, transform_indices = @transform_2, window_bounds = array<i64: 1, 128>}, {transform_indices = @transform_3, window_bounds = array<i64: 32, 128>}]} {
    %c0 = arith.constant 0 : index
    %c0_0 = arith.constant 0 : index
    %0 = vector.load %arg1[%c0, %c0_0] : memref<32x4xbf16, #tpu.memory_space<vmem>>, vector<32x4xbf16>
    %c0_1 = arith.constant 0 : index
    %c0_2 = arith.constant 0 : index
    %1 = vector.load %arg2[%c0_1, %c0_2] : memref<4x128xbf16, #tpu.memory_space<vmem>>, vector<4x128xbf16>
    %cst = arith.constant dense<0.000000e+00> : vector<32x128xf32>
    %2 = tpu.matmul %0, %1, %cst {dimension_numbers = #tpu.dot_dimension_numbers<[1], [0], [0], [1], [0, 0, 1, 1], [], []>} : vector<32x4xbf16>, vector<4x128xbf16>, vector<32x128xf32> -> vector<32x128xf32>
    %c0_3 = arith.constant 0 : index
    %c0_4 = arith.constant 0 : index
    %3 = vector.load %arg3[%c0_3, %c0_4] : memref<1x128xf32, #tpu.memory_space<vmem>>, vector<1x128xf32>
    %4 = vector.broadcast %3 : vector<1x128xf32> to vector<32x128xf32>
    %5 = arith.addf %2, %4 : vector<32x128xf32>
    %c0_5 = arith.constant 0 : index
    %c0_6 = arith.constant 0 : index
    %6 = vector.load %arg4[%c0_5, %c0_6] : memref<32x128xf32, #tpu.memory_space<vmem>>, vector<32x128xf32>
    tpu.vector_store %arg4[%c0_5, %c0_6], %5 {strides = array<i32>} : memref<32x128xf32, #tpu.memory_space<vmem>>, vector<32x128xf32>,
    return
  }
  func.func @transform_0(%arg0: i32) -> (i32, i32) {
    %c0_i32 = arith.constant 0 : i32
    %c0_i32_0 = arith.constant 0 : i32
    return %arg0, %c0_i32 : i32, i32
  }
  func.func @transform_1(%arg0: i32) -> (i32, i32) {
    %c0_i32 = arith.constant 0 : i32
    %c0_i32_0 = arith.constant 0 : i32
    %c0_i32_1 = arith.constant 0 : i32
    return %c0_i32, %c0_i32_0 : i32, i32
  }
  func.func @transform_2(%arg0: i32) -> (i32, i32) {
    %c0_i32 = arith.constant 0 : i32
    %c0_i32_0 = arith.constant 0 : i32
    %c0_i32_1 = arith.constant 0 : i32
    return %c0_i32, %c0_i32_0 : i32, i32
  }
  func.func @transform_3(%arg0: i32) -> (i32, i32) {
    %c0_i32 = arith.constant 0 : i32
    %c0_i32_0 = arith.constant 0 : i32
    return %arg0, %c0_i32 : i32, i32
  }
}

module attributes {stable_mosaic.version = 11 : i64} {
  func.func @_linear_kernel(%arg0: i32, %arg1: memref<16x8xbf16, #tpu.memory_space<vmem>>, %arg2: memref<8x128xbf16, #tpu.memory_space<vmem>>, %arg3: memref<1x128xf32, #tpu.memory_space<vmem>>, %arg4: memref<16x128xf32, #tpu.memory_space<vmem>>) attributes {dimension_semantics = [#tpu.dimension_semantics<parallel>], iteration_bounds = array<i64: 1>, scalar_prefetch = 0 : i64, scratch_operands = 0 : i64, tpu.core_type = #tpu.core_type<tc>, window_params = [{transform_indices = @transform_0, window_bounds = array<i64: 16, 8>}, {pipeline_mode = #tpu.pipeline_mode<synchronous>, transform_indices = @transform_1, window_bounds = array<i64: 8, 128>}, {pipeline_mode = #tpu.pipeline_mode<synchronous>, transform_indices = @transform_2, window_bounds = array<i64: 1, 128>}, {transform_indices = @transform_3, window_bounds = array<i64: 16, 128>}]} {
    %c0 = arith.constant 0 : index
    %c0_0 = arith.constant 0 : index
    %0 = vector.load %arg1[%c0, %c0_0] : memref<16x8xbf16, #tpu.memory_space<vmem>>, vector<16x8xbf16>
    %c0_1 = arith.constant 0 : index
    %c0_2 = arith.constant 0 : index
    %1 = vector.load %arg2[%c0_1, %c0_2] : memref<8x128xbf16, #tpu.memory_space<vmem>>, vector<8x128xbf16>
    %cst = arith.constant dense<0.000000e+00> : vector<16x128xf32>
    %2 = tpu.matmul %0, %1, %cst {dimension_numbers = #tpu.dot_dimension_numbers<[1], [0], [0], [1], [0, 0, 1, 1], [], []>} : vector<16x8xbf16>, vector<8x128xbf16>, vector<16x128xf32> -> vector<16x128xf32>
    %c0_3 = arith.constant 0 : index
    %c0_4 = arith.constant 0 : index
    %3 = vector.load %arg3[%c0_3, %c0_4] : memref<1x128xf32, #tpu.memory_space<vmem>>, vector<1x128xf32>
    %4 = vector.broadcast %3 : vector<1x128xf32> to vector<16x128xf32>
    %5 = arith.addf %2, %4 : vector<16x128xf32>
    %c0_5 = arith.constant 0 : index
    %c0_6 = arith.constant 0 : index
    %6 = vector.load %arg4[%c0_5, %c0_6] : memref<16x128xf32, #tpu.memory_space<vmem>>, vector<16x128xf32>
    tpu.vector_store %arg4[%c0_5, %c0_6], %5 {strides = array<i32>} : memref<16x128xf32, #tpu.memory_space<vmem>>, vector<16x128xf32>,
    return
  }
  func.func @transform_0(%arg0: i32) -> (i32, i32) {
    %c0_i32 = arith.constant 0 : i32
    %c0_i32_0 = arith.constant 0 : i32
    return %arg0, %c0_i32 : i32, i32
  }
  func.func @transform_1(%arg0: i32) -> (i32, i32) {
    %c0_i32 = arith.constant 0 : i32
    %c0_i32_0 = arith.constant 0 : i32
    %c0_i32_1 = arith.constant 0 : i32
    return %c0_i32, %c0_i32_0 : i32, i32
  }
  func.func @transform_2(%arg0: i32) -> (i32, i32) {
    %c0_i32 = arith.constant 0 : i32
    %c0_i32_0 = arith.constant 0 : i32
    %c0_i32_1 = arith.constant 0 : i32
    return %c0_i32, %c0_i32_0 : i32, i32
  }
  func.func @transform_3(%arg0: i32) -> (i32, i32) {
    %c0_i32 = arith.constant 0 : i32
    %c0_i32_0 = arith.constant 0 : i32
    return %arg0, %c0_i32 : i32, i32
  }
}

</mosaic_0001>

<bundles_post_ra>
// kernel: _encode.2
= control target key start
LH: loop header
LB: loop body
LE: loop exit
PB: predicated region body
PF: predicated region fallthrough
CT: control target
= control target key end

     0   :  { %vm32_vm0 = vcmask 1043456   ;;  %vm28_vm1 = vcmask 64512   ;;  %s141_s0 = inlined_call_operand.vmem [shape: bf16[16,8], index: 0, kind: input, shape index: {}]   ;;  %s142_s1 = inlined_call_operand.vmem [shape: bf16[8,128], index: 1, kind: input, shape index: {}]   ;;  %s143_s2 = inlined_call_operand.vmem [shape: f32[1,128], index: 2, kind: input, shape index: {}]   ;;  %s144_s3 = inlined_call_operand.hbm [shape: f32[16,128], index: 3, kind: output, shape index: {}]  }
   0x1   :  { %v18_v0 = vld [vmem:[%s142_s1] sm:$0xf] }
   0x2   :  { %v34_v1 = vsel %vm32_vm0, %v18_v0, 0  ;;  %v75_v2 = vld [vmem:[%s141_s0] sm:$0xff] }
   0x3   :  { %43 = vmatpush.bf16.msra.mxu0 %v34_v1 }
   0x4   :  { %8 = vsyncpa [#allocation3], 0  ;;  %v79_v3 = vld [vmem:[%s143_s2] ss:$0 sm:$0xff]  ;;  %s106_s18 = smov [#allocation2]   ;;  %s58_s21 = sshll.u32 %s144_s3, 4  ;;  %s59_s21 = int_to_ptr.hbm [resolvable:$true] %s58_s21 }
   0x5   :  { %s56_s19 = sshll.u32 %s106_s18, 4  ;;  %s107_s0 = smov 128   ;;  %s57_s19 = int_to_ptr.vmem [resolvable:$true] %s56_s19 }
   0x6   :  { %74 = vmatmul.msk.bf16.vlgmr.msra.gmra.mxu0 %vm28_vm1, %v75_v2  ;;  %s108_s22 = smov 8  }
  0x83   :  { %v45_v4 = vpop.f32.mrf.mxu0 }
  0x84   :  { %v46_v5 = vadd.f32 %v79_v3, %v45_v4 }
  0x86   :  { %50 = vst [vmem:[#allocation2] sm:$0xff] %v46_v5 }
  0x8b   :  { %v47_v6 = vpop.f32.mrf.mxu0 }
  0x8c   :  { %v48_v7 = vadd.f32 %v79_v3, %v47_v6 }
  0x8e   :  { %51 = vst [vmem:[#allocation2 + $0x8] sm:$0xff] %v48_v7 }
  0x8f   :  { %64 = dma.vmem_to_hbm [thread:$0]  %s57_s19, 256, %s59_s21, [#allocation3], %s107_s0, %s107_s0, %s108_s22  }
  0x90   :  { %104 = dma.done.wait [#allocation3], 256  }
  0x91   :  { %105 = vsyncadd [#allocation3], 4294967040 }
  0x92   :  { %69 = vsyncpa [#allocation3], 1 }

// kernel: _encode.3
= control target key start
LH: loop header
LB: loop body
LE: loop exit
PB: predicated region body
PF: predicated region fallthrough
CT: control target
= control target key end

     0   :  { %vm42_vm0 = vcmask 1041408   ;;  %vm35_vm1 = vcmask 31744   ;;  %s168_s0 = inlined_call_operand.vmem [shape: bf16[32,4], index: 0, kind: input, shape index: {}]   ;;  %s169_s1 = inlined_call_operand.vmem [shape: bf16[4,128], index: 1, kind: input, shape index: {}]   ;;  %s170_s2 = inlined_call_operand.vmem [shape: f32[1,128], index: 2, kind: input, shape index: {}]   ;;  %s171_s3 = inlined_call_operand.hbm [shape: f32[32,128], index: 3, kind: output, shape index: {}]  }
   0x1   :  { %v20_v0 = vld [vmem:[%s169_s1] sm:$0x3]  ;;  %v98_v3 = vld [vmem:[%s168_s0 + $0x8] sm:$0xff] }
   0x2   :  { %v44_v1 = vsel %vm42_vm0, %v20_v0, 0  ;;  %v97_v2 = vld [vmem:[%s168_s0] sm:$0xff] }
   0x3   :  { %53 = vmatpush.bf16.msra.mxu0 %v44_v1  ;;  %99 = vmatpush.bf16.msra.mxu1 %v44_v1 }
   0x4   :  { %8 = vsyncpa [#allocation3], 0  ;;  %v103_v4 = vld [vmem:[%s170_s2] ss:$0 sm:$0xff]  ;;  %s130_s1 = smov [#allocation2]   ;;  %s75_s22 = sshll.u32 %s171_s3, 4  ;;  %s76_s22 = int_to_ptr.hbm [resolvable:$true] %s75_s22 }
   0x5   :  { %s73_s20 = sshll.u32 %s130_s1, 4  ;;  %s131_s2 = smov 128   ;;  %s74_s20 = int_to_ptr.vmem [resolvable:$true] %s73_s20 }
   0x6   :  { %95 = vmatmul.msk.bf16.vlgmr.msra.gmra.mxu0 %vm35_vm1, %v97_v2  ;;  %96 = vmatmul.msk.bf16.vlgmr.msra.gmra.mxu1 %vm35_vm1, %v98_v3  ;;  %s132_s23 = smov 8  }
  0x83   :  { %v55_v5 = vpop.f32.mrf.mxu0  ;;  %v60_v6 = vpop.f32.mrf.mxu1 }
  0x84   :  { %v56_v7 = vadd.f32 %v103_v4, %v55_v5  ;;  %v61_v8 = vadd.f32 %v103_v4, %v60_v6 }
  0x86   :  { %65 = vst [vmem:[#allocation2] sm:$0xff] %v56_v7 }
  0x87   :  { %67 = vst [vmem:[#allocation2 + $0x10] sm:$0xff] %v61_v8 }
  0x8b   :  { %v57_v9 = vpop.f32.mrf.mxu0  ;;  %v62_v10 = vpop.f32.mrf.mxu1 }
  0x8c   :  { %v58_v11 = vadd.f32 %v103_v4, %v57_v9  ;;  %v63_v12 = vadd.f32 %v103_v4, %v62_v10 }
  0x8e   :  { %66 = vst [vmem:[#allocation2 + $0x8] sm:$0xff] %v58_v11 }
  0x8f   :  { %68 = vst [vmem:[#allocation2 + $0x18] sm:$0xff] %v63_v12 }
  0x90   :  { %81 = dma.vmem_to_hbm [thread:$0]  %s74_s20, 512, %s76_s22, [#allocation3], %s131_s2, %s131_s2, %s132_s23  }
  0x91   :  { %128 = dma.done.wait [#allocation3], 512  }
  0x92   :  { %129 = vsyncadd [#allocation3], 4294966784 }
  0x93   :  { %86 = vsyncpa [#allocation3], 1 }

</bundles_post_ra>
